<compile_context>
chip_gen: v5e
topology: v5e:2x2
jax: 0.10.0
libtpu: 0.0.40
codegen_flags: <defaults>
</compile_context>

<pallas_src>
import math
import functools

import numpy as np
import jax
import jax.numpy as jnp
from jax.experimental import pallas as pl
from jax.experimental.pallas import tpu as pltpu


def _divisor_tile(n, unit, want):
    """Largest multiple of `unit` that divides `n` and is <= min(want, n); None if none."""
    t = (min(want, n) // unit) * unit
    while t >= unit:
        if n % t == 0:
            return t
        t -= unit
    return None


def four_pos_fusion_kernel(pos_s_sm, pos_e_sm,   # scalar-prefetch SMEM refs: [B, L] int32
                           ps_i_ref, pe_i_ref,   # VMEM: (1, TI, 1) int32 (i-side positions)
                           bd_ref,               # VMEM: (P, 2*T_pad, P*H) lane-shifted tables
                           bias_ref,             # VMEM: (1, P*H) f32 (bias tiled P times)
                           out_ref,              # VMEM: (1, TI, TJ*H) f32
                           *, tile_j, pack, t_pad, max_seq_len, hidden, compute_dtype):
    b = pl.program_id(0)
    j0 = pl.program_id(2) * tile_j
    ti = ps_i_ref.shape[1]
    two_t = 2 * t_pad
    gw = pack * hidden                            # lane width of one packed j-group

    ps_i = ps_i_ref[0]                            # (TI, 1) int32
    pe_i = pe_i_ref[0]                            # (TI, 1) int32
    lane_t = jax.lax.broadcasted_iota(jnp.int32, (ti, two_t), 1)
    bias = bias_ref[...]                          # (1, gw) f32

    # Static unroll over the j-groups of this tile; each group packs `pack` consecutive
    # j columns into one lane-dense (TI, gw) slab and one unmasked store.
    for g in range(tile_j // pack):
        acc = None
        for p in range(pack):
            j = j0 + g * pack + p                 # dynamic key-column index
            # relative-position indices for this j as (TI, 1) vectors (built in-kernel,
            # j-side value read as a scalar from SMEM)
            d_ss = ps_i + (max_seq_len - pos_s_sm[b, j])
            d_ee = pe_i + (max_seq_len + t_pad - pos_e_sm[b, j])
            # fused one-hot: ss hit lands in [0, T_pad), ee hit in [T_pad, 2*T_pad)
            oh = ((lane_t == d_ss) | (lane_t == d_ee)).astype(compute_dtype)
            # gather + folded linear on the MXU; bd_ref[p] has the stacked table placed
            # in lane group p (zeros elsewhere), so the accumulator stays lane-dense.
            contrib = jnp.dot(oh, bd_ref[p], preferred_element_type=jnp.float32)
            acc = contrib if acc is None else acc + contrib
        out_ref[0, :, g * gw:(g + 1) * gw] = jnp.maximum(acc + bias, 0.0)


def four_pos_fusion_embedding(pos_s, pos_e, pe_ss, pe_ee, w_t, bias, max_seq_len,
                              tile_i=256, tile_j=16, compute_dtype=jnp.float32):
    """pos_s, pos_e: [B, L] int. pe_ss/pe_ee: [T, H] (T = 2*max_seq_len+1).
    w_t: [2H, H] (= nn.Linear(2H, H).weight.T).  bias: [H]."""
    B, L = pos_s.shape
    T, H = pe_ss.shape
    assert w_t.shape == (2 * H, H) and bias.shape == (H,)

    # ---- fold the 2H->H linear into the gather tables (wrapper-side, tiny) ----
    hp = jax.lax.Precision.HIGHEST
    A_ss = jnp.dot(pe_ss.astype(jnp.float32), w_t[:H].astype(jnp.float32), precision=hp)
    A_ee = jnp.dot(pe_ee.astype(jnp.float32), w_t[H:].astype(jnp.float32), precision=hp)

    # pad table rows so the one-hot lane extent (2*t_pad) is a multiple of 128
    t_pad = ((T + 63) // 64) * 64
    A = jnp.zeros((2 * t_pad, H), jnp.float32)
    A = A.at[:T].set(A_ss).at[t_pad:t_pad + T].set(A_ee)   # fused [A_ss; A_ee] table

    # ---- lane packing: P consecutive j columns per 128-lane output group ----
    P = 128 // H if 128 % H == 0 else 1
    TJ = _divisor_tile(L, P, max(tile_j, P))
    if TJ is None:                                # L not divisible by P -> unpacked path
        P = 1
        unit = 128 // math.gcd(128, H)            # keep the out-block lane width legal
        TJ = _divisor_tile(L, unit, max(tile_j, unit)) or L
    TI = _divisor_tile(L, 8, max(tile_i, 8)) or L

    # lane-shifted table copies: bd[p][:, p*H:(p+1)*H] = A, zeros elsewhere
    bd = jnp.zeros((P, 2 * t_pad, P * H), jnp.float32)
    for p in range(P):
        bd = bd.at[p, :, p * H:(p + 1) * H].set(A)
    bd = bd.astype(compute_dtype)
    bias_packed = jnp.tile(bias.astype(jnp.float32), P).reshape(1, P * H)

    pos_s = pos_s.astype(jnp.int32)
    pos_e = pos_e.astype(jnp.int32)
    ps_i = pos_s.reshape(B, L, 1)                 # i-side position vectors (VMEM)
    pe_i = pos_e.reshape(B, L, 1)

    kernel = functools.partial(
        four_pos_fusion_kernel, tile_j=TJ, pack=P, t_pad=t_pad,
        max_seq_len=max_seq_len, hidden=H, compute_dtype=compute_dtype)

    out2d = pl.pallas_call(
        kernel,
        out_shape=jax.ShapeDtypeStruct((B, L, L * H), jnp.float32),
        grid_spec=pltpu.PrefetchScalarGridSpec(
            num_scalar_prefetch=2,                 # pos_s, pos_e -> SMEM (j-side scalars)
            grid=(B, L // TI, L // TJ),
            in_specs=[
                pl.BlockSpec((1, TI, 1), lambda b, it, jt, *_: (b, it, 0)),    # ps_i
                pl.BlockSpec((1, TI, 1), lambda b, it, jt, *_: (b, it, 0)),    # pe_i
                pl.BlockSpec((P, 2 * t_pad, P * H),
                             lambda b, it, jt, *_: (0, 0, 0)),                 # tables
                pl.BlockSpec((1, P * H), lambda b, it, jt, *_: (0, 0)),        # bias
            ],
            out_specs=pl.BlockSpec((1, TI, TJ * H),
                                   lambda b, it, jt, *_: (b, it, jt)),
        ),
        compiler_params=pltpu.CompilerParams(
            dimension_semantics=("parallel", "parallel", "parallel"),
            vmem_limit_bytes=32 * 1024 * 1024),
    )(pos_s, pos_e, ps_i, pe_i, bd, bias_packed)

    return out2d.reshape(B, L, L, H)              # free: same bytes, row-major


def reference(pos_s, pos_e, pe_ss, pe_ee, w_t, bias, max_seq_len):
    idx_ss = pos_s[:, :, None] - pos_s[:, None, :] + max_seq_len
    idx_ee = pos_e[:, :, None] - pos_e[:, None, :] + max_seq_len
    pe2 = jnp.concatenate([pe_ss[idx_ss], pe_ee[idx_ee]], axis=-1)
    y = jnp.matmul(pe2, w_t, precision=jax.lax.Precision.HIGHEST) + bias
    return jax.nn.relu(y)


if __name__ == "__main__":
    B, L, H, max_seq_len = 2, 8, 32, 16
    T = 2 * max_seq_len + 1                       # index range of (diff + max_seq_len)

    key = jax.random.PRNGKey(0)
    k1, k2, k3, k4, k5, k6, k7, k8 = jax.random.split(key, 8)

    # deterministic synthetic parameters (shapes implied by __init__)
    pe_ss = jax.random.normal(k1, (T, H), jnp.float32)
    pe_se = jax.random.normal(k2, (T, H), jnp.float32)   # dead in the torch forward
    pe_es = jax.random.normal(k3, (T, H), jnp.float32)   # dead in the torch forward
    pe_ee = jax.random.normal(k4, (T, H), jnp.float32)
    # nn.Linear(2H, H): weight [H, 2H], bias [H]; kernel consumes weight.T = [2H, H]
    W = jax.random.normal(k5, (H, 2 * H), jnp.float32) * (1.0 / math.sqrt(2 * H))
    bias = jax.random.normal(k6, (H,), jnp.float32) * 0.01
    w_t = W.T

    # deterministic inputs; keep diffs within [-max_seq_len, max_seq_len] so indices are valid
    pos_s = jax.random.randint(k7, (B, L), 0, max_seq_len, dtype=jnp.int32)
    pos_e = jnp.minimum(pos_s + jax.random.randint(k8, (B, L), 0, 3, dtype=jnp.int32),
                        max_seq_len - 1)

    out = four_pos_fusion_embedding(pos_s, pos_e, pe_ss, pe_ee, w_t, bias, max_seq_len)
    out = jax.block_until_ready(out)

    ref = reference(pos_s, pos_e, pe_ss, pe_ee, w_t, bias, max_seq_len)
    np.testing.assert_allclose(np.asarray(out), np.asarray(ref), rtol=1e-4, atol=1e-4)
    print("KERNEL_OK")
</pallas_src>

<mosaic_0001>
module attributes {stable_mosaic.version = 11 : i64} {
  func.func @four_pos_fusion_kernel(%arg0: i32, %arg1: i32, %arg2: i32, %arg3: memref<2x8xi32, #tpu.memory_space<smem>>, %arg4: memref<2x8xi32, #tpu.memory_space<smem>>, %arg5: memref<1x8x1xi32, #tpu.memory_space<vmem>>, %arg6: memref<1x8x1xi32, #tpu.memory_space<vmem>>, %arg7: memref<4x128x128xf32, #tpu.memory_space<vmem>>, %arg8: memref<1x128xf32, #tpu.memory_space<vmem>>, %arg9: memref<1x8x256xf32, #tpu.memory_space<vmem>>) attributes {dimension_semantics = [#tpu.dimension_semantics<parallel>, #tpu.dimension_semantics<parallel>, #tpu.dimension_semantics<parallel>], iteration_bounds = array<i64: 2, 1, 1>, scalar_prefetch = 2 : i64, scratch_operands = 0 : i64, tpu.core_type = #tpu.core_type<tc>, window_params = [{transform_indices = @transform_0, window_bounds = array<i64: 1, 8, 1>}, {transform_indices = @transform_1, window_bounds = array<i64: 1, 8, 1>}, {pipeline_mode = #tpu.pipeline_mode<synchronous>, transform_indices = @transform_2, window_bounds = array<i64: 4, 128, 128>}, {pipeline_mode = #tpu.pipeline_mode<synchronous>, transform_indices = @transform_3, window_bounds = array<i64: 1, 128>}, {transform_indices = @transform_4, window_bounds = array<i64: 1, 8, 256>}]} {
    %c8_i32 = arith.constant 8 : i32
    %0 = arith.muli %arg2, %c8_i32 : i32
    %c0 = arith.constant 0 : index
    %c0_0 = arith.constant 0 : index
    %c0_1 = arith.constant 0 : index
    %1 = vector.load %arg5[%c0, %c0_0, %c0_1] : memref<1x8x1xi32, #tpu.memory_space<vmem>>, vector<1x8x1xi32>
    %2 = vector.shape_cast %1 : vector<1x8x1xi32> to vector<8x1xi32>
    %c0_2 = arith.constant 0 : index
    %c0_3 = arith.constant 0 : index
    %c0_4 = arith.constant 0 : index
    %3 = vector.load %arg6[%c0_2, %c0_3, %c0_4] : memref<1x8x1xi32, #tpu.memory_space<vmem>>, vector<1x8x1xi32>
    %4 = vector.shape_cast %3 : vector<1x8x1xi32> to vector<8x1xi32>
    %5 = tpu.iota {dimensions = array<i32: 1>} : vector<8x128xi32>
    %c0_5 = arith.constant 0 : index
    %c0_6 = arith.constant 0 : index
    %6 = vector.load %arg8[%c0_5, %c0_6] : memref<1x128xf32, #tpu.memory_space<vmem>>, vector<1x128xf32>
    %c0_i32 = arith.constant 0 : i32
    %7 = arith.addi %0, %c0_i32 : i32
    %c0_i32_7 = arith.constant 0 : i32
    %8 = arith.addi %7, %c0_i32_7 : i32
    %9 = arith.index_cast %arg0 : i32 to index
    %10 = arith.index_cast %8 : i32 to index
    %11 = memref.load %arg3[%9, %10] : memref<2x8xi32, #tpu.memory_space<smem>>
    %c16_i32 = arith.constant 16 : i32
    %12 = arith.subi %c16_i32, %11 : i32
    %13 = vector.broadcast %12 : i32 to vector<8x1xi32>
    %14 = arith.addi %2, %13 : vector<8x1xi32>
    %15 = arith.index_cast %arg0 : i32 to index
    %16 = arith.index_cast %8 : i32 to index
    %17 = memref.load %arg4[%15, %16] : memref<2x8xi32, #tpu.memory_space<smem>>
    %c80_i32 = arith.constant 80 : i32
    %18 = arith.subi %c80_i32, %17 : i32
    %19 = vector.broadcast %18 : i32 to vector<8x1xi32>
    %20 = arith.addi %4, %19 : vector<8x1xi32>
    %21 = vector.broadcast %14 : vector<8x1xi32> to vector<8x128xi32>
    %22 = arith.cmpi eq, %5, %21 : vector<8x128xi32>
    %23 = vector.broadcast %20 : vector<8x1xi32> to vector<8x128xi32>
    %24 = arith.cmpi eq, %5, %23 : vector<8x128xi32>
    %25 = arith.ori %22, %24 : vector<8x128xi1>
    %26 = arith.extui %25 : vector<8x128xi1> to vector<8x128xi32>
    %27 = arith.sitofp %26 : vector<8x128xi32> to vector<8x128xf32>
    %c0_8 = arith.constant 0 : index
    %c0_9 = arith.constant 0 : index
    %c0_10 = arith.constant 0 : index
    %28 = vector.load %arg7[%c0_8, %c0_9, %c0_10] : memref<4x128x128xf32, #tpu.memory_space<vmem>>, vector<1x128x128xf32>
    %29 = vector.shape_cast %28 : vector<1x128x128xf32> to vector<128x128xf32>
    %cst = arith.constant dense<0.000000e+00> : vector<8x128xf32>
    %30 = tpu.matmul %27, %29, %cst {dimension_numbers = #tpu.dot_dimension_numbers<[1], [0], [0], [1], [0, 0, 1, 1], [], []>} : vector<8x128xf32>, vector<128x128xf32>, vector<8x128xf32> -> vector<8x128xf32>
    %c0_i32_11 = arith.constant 0 : i32
    %31 = arith.addi %0, %c0_i32_11 : i32
    %c1_i32 = arith.constant 1 : i32
    %32 = arith.addi %31, %c1_i32 : i32
    %33 = arith.index_cast %arg0 : i32 to index
    %34 = arith.index_cast %32 : i32 to index
    %35 = memref.load %arg3[%33, %34] : memref<2x8xi32, #tpu.memory_space<smem>>
    %c16_i32_12 = arith.constant 16 : i32
    %36 = arith.subi %c16_i32_12, %35 : i32
    %37 = vector.broadcast %36 : i32 to vector<8x1xi32>
    %38 = arith.addi %2, %37 : vector<8x1xi32>
    %39 = arith.index_cast %arg0 : i32 to index
    %40 = arith.index_cast %32 : i32 to index
    %41 = memref.load %arg4[%39, %40] : memref<2x8xi32, #tpu.memory_space<smem>>
    %c80_i32_13 = arith.constant 80 : i32
    %42 = arith.subi %c80_i32_13, %41 : i32
    %43 = vector.broadcast %42 : i32 to vector<8x1xi32>
    %44 = arith.addi %4, %43 : vector<8x1xi32>
    %45 = vector.broadcast %38 : vector<8x1xi32> to vector<8x128xi32>
    %46 = arith.cmpi eq, %5, %45 : vector<8x128xi32>
    %47 = vector.broadcast %44 : vector<8x1xi32> to vector<8x128xi32>
    %48 = arith.cmpi eq, %5, %47 : vector<8x128xi32>
    %49 = arith.ori %46, %48 : vector<8x128xi1>
    %50 = arith.extui %49 : vector<8x128xi1> to vector<8x128xi32>
    %51 = arith.sitofp %50 : vector<8x128xi32> to vector<8x128xf32>
    %c1 = arith.constant 1 : index
    %c0_14 = arith.constant 0 : index
    %c0_15 = arith.constant 0 : index
    %52 = vector.load %arg7[%c1, %c0_14, %c0_15] : memref<4x128x128xf32, #tpu.memory_space<vmem>>, vector<1x128x128xf32>
    %53 = vector.shape_cast %52 : vector<1x128x128xf32> to vector<128x128xf32>
    %cst_16 = arith.constant dense<0.000000e+00> : vector<8x128xf32>
    %54 = tpu.matmul %51, %53, %cst_16 {dimension_numbers = #tpu.dot_dimension_numbers<[1], [0], [0], [1], [0, 0, 1, 1], [], []>} : vector<8x128xf32>, vector<128x128xf32>, vector<8x128xf32> -> vector<8x128xf32>
    %55 = arith.addf %30, %54 : vector<8x128xf32>
    %c0_i32_17 = arith.constant 0 : i32
    %56 = arith.addi %0, %c0_i32_17 : i32
    %c2_i32 = arith.constant 2 : i32
    %57 = arith.addi %56, %c2_i32 : i32
    %58 = arith.index_cast %arg0 : i32 to index
    %59 = arith.index_cast %57 : i32 to index
    %60 = memref.load %arg3[%58, %59] : memref<2x8xi32, #tpu.memory_space<smem>>
    %c16_i32_18 = arith.constant 16 : i32
    %61 = arith.subi %c16_i32_18, %60 : i32
    %62 = vector.broadcast %61 : i32 to vector<8x1xi32>
    %63 = arith.addi %2, %62 : vector<8x1xi32>
    %64 = arith.index_cast %arg0 : i32 to index
    %65 = arith.index_cast %57 : i32 to index
    %66 = memref.load %arg4[%64, %65] : memref<2x8xi32, #tpu.memory_space<smem>>
    %c80_i32_19 = arith.constant 80 : i32
    %67 = arith.subi %c80_i32_19, %66 : i32
    %68 = vector.broadcast %67 : i32 to vector<8x1xi32>
    %69 = arith.addi %4, %68 : vector<8x1xi32>
    %70 = vector.broadcast %63 : vector<8x1xi32> to vector<8x128xi32>
    %71 = arith.cmpi eq, %5, %70 : vector<8x128xi32>
    %72 = vector.broadcast %69 : vector<8x1xi32> to vector<8x128xi32>
    %73 = arith.cmpi eq, %5, %72 : vector<8x128xi32>
    %74 = arith.ori %71, %73 : vector<8x128xi1>
    %75 = arith.extui %74 : vector<8x128xi1> to vector<8x128xi32>
    %76 = arith.sitofp %75 : vector<8x128xi32> to vector<8x128xf32>
    %c2 = arith.constant 2 : index
    %c0_20 = arith.constant 0 : index
    %c0_21 = arith.constant 0 : index
    %77 = vector.load %arg7[%c2, %c0_20, %c0_21] : memref<4x128x128xf32, #tpu.memory_space<vmem>>, vector<1x128x128xf32>
    %78 = vector.shape_cast %77 : vector<1x128x128xf32> to vector<128x128xf32>
    %cst_22 = arith.constant dense<0.000000e+00> : vector<8x128xf32>
    %79 = tpu.matmul %76, %78, %cst_22 {dimension_numbers = #tpu.dot_dimension_numbers<[1], [0], [0], [1], [0, 0, 1, 1], [], []>} : vector<8x128xf32>, vector<128x128xf32>, vector<8x128xf32> -> vector<8x128xf32>
    %80 = arith.addf %55, %79 : vector<8x128xf32>
    %c0_i32_23 = arith.constant 0 : i32
    %81 = arith.addi %0, %c0_i32_23 : i32
    %c3_i32 = arith.constant 3 : i32
    %82 = arith.addi %81, %c3_i32 : i32
    %83 = arith.index_cast %arg0 : i32 to index
    %84 = arith.index_cast %82 : i32 to index
    %85 = memref.load %arg3[%83, %84] : memref<2x8xi32, #tpu.memory_space<smem>>
    %c16_i32_24 = arith.constant 16 : i32
    %86 = arith.subi %c16_i32_24, %85 : i32
    %87 = vector.broadcast %86 : i32 to vector<8x1xi32>
    %88 = arith.addi %2, %87 : vector<8x1xi32>
    %89 = arith.index_cast %arg0 : i32 to index
    %90 = arith.index_cast %82 : i32 to index
    %91 = memref.load %arg4[%89, %90] : memref<2x8xi32, #tpu.memory_space<smem>>
    %c80_i32_25 = arith.constant 80 : i32
    %92 = arith.subi %c80_i32_25, %91 : i32
    %93 = vector.broadcast %92 : i32 to vector<8x1xi32>
    %94 = arith.addi %4, %93 : vector<8x1xi32>
    %95 = vector.broadcast %88 : vector<8x1xi32> to vector<8x128xi32>
    %96 = arith.cmpi eq, %5, %95 : vector<8x128xi32>
    %97 = vector.broadcast %94 : vector<8x1xi32> to vector<8x128xi32>
    %98 = arith.cmpi eq, %5, %97 : vector<8x128xi32>
    %99 = arith.ori %96, %98 : vector<8x128xi1>
    %100 = arith.extui %99 : vector<8x128xi1> to vector<8x128xi32>
    %101 = arith.sitofp %100 : vector<8x128xi32> to vector<8x128xf32>
    %c3 = arith.constant 3 : index
    %c0_26 = arith.constant 0 : index
    %c0_27 = arith.constant 0 : index
    %102 = vector.load %arg7[%c3, %c0_26, %c0_27] : memref<4x128x128xf32, #tpu.memory_space<vmem>>, vector<1x128x128xf32>
    %103 = vector.shape_cast %102 : vector<1x128x128xf32> to vector<128x128xf32>
    %cst_28 = arith.constant dense<0.000000e+00> : vector<8x128xf32>
    %104 = tpu.matmul %101, %103, %cst_28 {dimension_numbers = #tpu.dot_dimension_numbers<[1], [0], [0], [1], [0, 0, 1, 1], [], []>} : vector<8x128xf32>, vector<128x128xf32>, vector<8x128xf32> -> vector<8x128xf32>
    %105 = arith.addf %80, %104 : vector<8x128xf32>
    %106 = vector.broadcast %6 : vector<1x128xf32> to vector<8x128xf32>
    %107 = arith.addf %105, %106 : vector<8x128xf32>
    %cst_29 = arith.constant 0.000000e+00 : f32
    %108 = vector.broadcast %cst_29 : f32 to vector<8x128xf32>
    %109 = arith.maximumf %107, %108 : vector<8x128xf32>
    %c0_30 = arith.constant 0 : index
    %c0_31 = arith.constant 0 : index
    %c0_32 = arith.constant 0 : index
    %110 = vector.load %arg9[%c0_30, %c0_31, %c0_32] : memref<1x8x256xf32, #tpu.memory_space<vmem>>, vector<1x8x128xf32>
    %111 = vector.shape_cast %110 : vector<1x8x128xf32> to vector<8x128xf32>
    %112 = vector.shape_cast %109 : vector<8x128xf32> to vector<1x8x128xf32>
    tpu.vector_store %arg9[%c0_30, %c0_31, %c0_32], %112 {strides = array<i32>} : memref<1x8x256xf32, #tpu.memory_space<vmem>>, vector<1x8x128xf32>,
    %c4_i32 = arith.constant 4 : i32
    %113 = arith.addi %0, %c4_i32 : i32
    %c0_i32_33 = arith.constant 0 : i32
    %114 = arith.addi %113, %c0_i32_33 : i32
    %115 = arith.index_cast %arg0 : i32 to index
    %116 = arith.index_cast %114 : i32 to index
    %117 = memref.load %arg3[%115, %116] : memref<2x8xi32, #tpu.memory_space<smem>>
    %c16_i32_34 = arith.constant 16 : i32
    %118 = arith.subi %c16_i32_34, %117 : i32
    %119 = vector.broadcast %118 : i32 to vector<8x1xi32>
    %120 = arith.addi %2, %119 : vector<8x1xi32>
    %121 = arith.index_cast %arg0 : i32 to index
    %122 = arith.index_cast %114 : i32 to index
    %123 = memref.load %arg4[%121, %122] : memref<2x8xi32, #tpu.memory_space<smem>>
    %c80_i32_35 = arith.constant 80 : i32
    %124 = arith.subi %c80_i32_35, %123 : i32
    %125 = vector.broadcast %124 : i32 to vector<8x1xi32>
    %126 = arith.addi %4, %125 : vector<8x1xi32>
    %127 = vector.broadcast %120 : vector<8x1xi32> to vector<8x128xi32>
    %128 = arith.cmpi eq, %5, %127 : vector<8x128xi32>
    %129 = vector.broadcast %126 : vector<8x1xi32> to vector<8x128xi32>
    %130 = arith.cmpi eq, %5, %129 : vector<8x128xi32>
    %131 = arith.ori %128, %130 : vector<8x128xi1>
    %132 = arith.extui %131 : vector<8x128xi1> to vector<8x128xi32>
    %133 = arith.sitofp %132 : vector<8x128xi32> to vector<8x128xf32>
    %c0_36 = arith.constant 0 : index
    %c0_37 = arith.constant 0 : index
    %c0_38 = arith.constant 0 : index
    %134 = vector.load %arg7[%c0_36, %c0_37, %c0_38] : memref<4x128x128xf32, #tpu.memory_space<vmem>>, vector<1x128x128xf32>
    %135 = vector.shape_cast %134 : vector<1x128x128xf32> to vector<128x128xf32>
    %cst_39 = arith.constant dense<0.000000e+00> : vector<8x128xf32>
    %136 = tpu.matmul %133, %135, %cst_39 {dimension_numbers = #tpu.dot_dimension_numbers<[1], [0], [0], [1], [0, 0, 1, 1], [], []>} : vector<8x128xf32>, vector<128x128xf32>, vector<8x128xf32> -> vector<8x128xf32>
    %c4_i32_40 = arith.constant 4 : i32
    %137 = arith.addi %0, %c4_i32_40 : i32
    %c1_i32_41 = arith.constant 1 : i32
    %138 = arith.addi %137, %c1_i32_41 : i32
    %139 = arith.index_cast %arg0 : i32 to index
    %140 = arith.index_cast %138 : i32 to index
    %141 = memref.load %arg3[%139, %140] : memref<2x8xi32, #tpu.memory_space<smem>>
    %c16_i32_42 = arith.constant 16 : i32
    %142 = arith.subi %c16_i32_42, %141 : i32
    %143 = vector.broadcast %142 : i32 to vector<8x1xi32>
    %144 = arith.addi %2, %143 : vector<8x1xi32>
    %145 = arith.index_cast %arg0 : i32 to index
    %146 = arith.index_cast %138 : i32 to index
    %147 = memref.load %arg4[%145, %146] : memref<2x8xi32, #tpu.memory_space<smem>>
    %c80_i32_43 = arith.constant 80 : i32
    %148 = arith.subi %c80_i32_43, %147 : i32
    %149 = vector.broadcast %148 : i32 to vector<8x1xi32>
    %150 = arith.addi %4, %149 : vector<8x1xi32>
    %151 = vector.broadcast %144 : vector<8x1xi32> to vector<8x128xi32>
    %152 = arith.cmpi eq, %5, %151 : vector<8x128xi32>
    %153 = vector.broadcast %150 : vector<8x1xi32> to vector<8x128xi32>
    %154 = arith.cmpi eq, %5, %153 : vector<8x128xi32>
    %155 = arith.ori %152, %154 : vector<8x128xi1>
    %156 = arith.extui %155 : vector<8x128xi1> to vector<8x128xi32>
    %157 = arith.sitofp %156 : vector<8x128xi32> to vector<8x128xf32>
    %c1_44 = arith.constant 1 : index
    %c0_45 = arith.constant 0 : index
    %c0_46 = arith.constant 0 : index
    %158 = vector.load %arg7[%c1_44, %c0_45, %c0_46] : memref<4x128x128xf32, #tpu.memory_space<vmem>>, vector<1x128x128xf32>
    %159 = vector.shape_cast %158 : vector<1x128x128xf32> to vector<128x128xf32>
    %cst_47 = arith.constant dense<0.000000e+00> : vector<8x128xf32>
    %160 = tpu.matmul %157, %159, %cst_47 {dimension_numbers = #tpu.dot_dimension_numbers<[1], [0], [0], [1], [0, 0, 1, 1], [], []>} : vector<8x128xf32>, vector<128x128xf32>, vector<8x128xf32> -> vector<8x128xf32>
    %161 = arith.addf %136, %160 : vector<8x128xf32>
    %c4_i32_48 = arith.constant 4 : i32
    %162 = arith.addi %0, %c4_i32_48 : i32
    %c2_i32_49 = arith.constant 2 : i32
    %163 = arith.addi %162, %c2_i32_49 : i32
    %164 = arith.index_cast %arg0 : i32 to index
    %165 = arith.index_cast %163 : i32 to index
    %166 = memref.load %arg3[%164, %165] : memref<2x8xi32, #tpu.memory_space<smem>>
    %c16_i32_50 = arith.constant 16 : i32
    %167 = arith.subi %c16_i32_50, %166 : i32
    %168 = vector.broadcast %167 : i32 to vector<8x1xi32>
    %169 = arith.addi %2, %168 : vector<8x1xi32>
    %170 = arith.index_cast %arg0 : i32 to index
    %171 = arith.index_cast %163 : i32 to index
    %172 = memref.load %arg4[%170, %171] : memref<2x8xi32, #tpu.memory_space<smem>>
    %c80_i32_51 = arith.constant 80 : i32
    %173 = arith.subi %c80_i32_51, %172 : i32
    %174 = vector.broadcast %173 : i32 to vector<8x1xi32>
    %175 = arith.addi %4, %174 : vector<8x1xi32>
    %176 = vector.broadcast %169 : vector<8x1xi32> to vector<8x128xi32>
    %177 = arith.cmpi eq, %5, %176 : vector<8x128xi32>
    %178 = vector.broadcast %175 : vector<8x1xi32> to vector<8x128xi32>
    %179 = arith.cmpi eq, %5, %178 : vector<8x128xi32>
    %180 = arith.ori %177, %179 : vector<8x128xi1>
    %181 = arith.extui %180 : vector<8x128xi1> to vector<8x128xi32>
    %182 = arith.sitofp %181 : vector<8x128xi32> to vector<8x128xf32>
    %c2_52 = arith.constant 2 : index
    %c0_53 = arith.constant 0 : index
    %c0_54 = arith.constant 0 : index
    %183 = vector.load %arg7[%c2_52, %c0_53, %c0_54] : memref<4x128x128xf32, #tpu.memory_space<vmem>>, vector<1x128x128xf32>
    %184 = vector.shape_cast %183 : vector<1x128x128xf32> to vector<128x128xf32>
    %cst_55 = arith.constant dense<0.000000e+00> : vector<8x128xf32>
    %185 = tpu.matmul %182, %184, %cst_55 {dimension_numbers = #tpu.dot_dimension_numbers<[1], [0], [0], [1], [0, 0, 1, 1], [], []>} : vector<8x128xf32>, vector<128x128xf32>, vector<8x128xf32> -> vector<8x128xf32>
    %186 = arith.addf %161, %185 : vector<8x128xf32>
    %c4_i32_56 = arith.constant 4 : i32
    %187 = arith.addi %0, %c4_i32_56 : i32
    %c3_i32_57 = arith.constant 3 : i32
    %188 = arith.addi %187, %c3_i32_57 : i32
    %189 = arith.index_cast %arg0 : i32 to index
    %190 = arith.index_cast %188 : i32 to index
    %191 = memref.load %arg3[%189, %190] : memref<2x8xi32, #tpu.memory_space<smem>>
    %c16_i32_58 = arith.constant 16 : i32
    %192 = arith.subi %c16_i32_58, %191 : i32
    %193 = vector.broadcast %192 : i32 to vector<8x1xi32>
    %194 = arith.addi %2, %193 : vector<8x1xi32>
    %195 = arith.index_cast %arg0 : i32 to index
    %196 = arith.index_cast %188 : i32 to index
    %197 = memref.load %arg4[%195, %196] : memref<2x8xi32, #tpu.memory_space<smem>>
    %c80_i32_59 = arith.constant 80 : i32
    %198 = arith.subi %c80_i32_59, %197 : i32
    %199 = vector.broadcast %198 : i32 to vector<8x1xi32>
    %200 = arith.addi %4, %199 : vector<8x1xi32>
    %201 = vector.broadcast %194 : vector<8x1xi32> to vector<8x128xi32>
    %202 = arith.cmpi eq, %5, %201 : vector<8x128xi32>
    %203 = vector.broadcast %200 : vector<8x1xi32> to vector<8x128xi32>
    %204 = arith.cmpi eq, %5, %203 : vector<8x128xi32>
    %205 = arith.ori %202, %204 : vector<8x128xi1>
    %206 = arith.extui %205 : vector<8x128xi1> to vector<8x128xi32>
    %207 = arith.sitofp %206 : vector<8x128xi32> to vector<8x128xf32>
    %c3_60 = arith.constant 3 : index
    %c0_61 = arith.constant 0 : index
    %c0_62 = arith.constant 0 : index
    %208 = vector.load %arg7[%c3_60, %c0_61, %c0_62] : memref<4x128x128xf32, #tpu.memory_space<vmem>>, vector<1x128x128xf32>
    %209 = vector.shape_cast %208 : vector<1x128x128xf32> to vector<128x128xf32>
    %cst_63 = arith.constant dense<0.000000e+00> : vector<8x128xf32>
    %210 = tpu.matmul %207, %209, %cst_63 {dimension_numbers = #tpu.dot_dimension_numbers<[1], [0], [0], [1], [0, 0, 1, 1], [], []>} : vector<8x128xf32>, vector<128x128xf32>, vector<8x128xf32> -> vector<8x128xf32>
    %211 = arith.addf %186, %210 : vector<8x128xf32>
    %212 = vector.broadcast %6 : vector<1x128xf32> to vector<8x128xf32>
    %213 = arith.addf %211, %212 : vector<8x128xf32>
    %cst_64 = arith.constant 0.000000e+00 : f32
    %214 = vector.broadcast %cst_64 : f32 to vector<8x128xf32>
    %215 = arith.maximumf %213, %214 : vector<8x128xf32>
    %c0_65 = arith.constant 0 : index
    %c0_66 = arith.constant 0 : index
    %c128 = arith.constant 128 : index
    %216 = vector.load %arg9[%c0_65, %c0_66, %c128] : memref<1x8x256xf32, #tpu.memory_space<vmem>>, vector<1x8x128xf32>
    %217 = vector.shape_cast %216 : vector<1x8x128xf32> to vector<8x128xf32>
    %218 = vector.shape_cast %215 : vector<8x128xf32> to vector<1x8x128xf32>
    tpu.vector_store %arg9[%c0_65, %c0_66, %c128], %218 {strides = array<i32>} : memref<1x8x256xf32, #tpu.memory_space<vmem>>, vector<1x8x128xf32>,
    return
  }
  func.func @transform_0(%arg0: i32, %arg1: i32, %arg2: i32, %arg3: memref<2x8xi32, #tpu.memory_space<smem>>, %arg4: memref<2x8xi32, #tpu.memory_space<smem>>) -> (i32, i32, i32) {
    %c0_i32 = arith.constant 0 : i32
    %c0_i32_0 = arith.constant 0 : i32
    return %arg0, %arg1, %c0_i32 : i32, i32, i32
  }
  func.func @transform_1(%arg0: i32, %arg1: i32, %arg2: i32, %arg3: memref<2x8xi32, #tpu.memory_space<smem>>, %arg4: memref<2x8xi32, #tpu.memory_space<smem>>) -> (i32, i32, i32) {
    %c0_i32 = arith.constant 0 : i32
    %c0_i32_0 = arith.constant 0 : i32
    return %arg0, %arg1, %c0_i32 : i32, i32, i32
  }
  func.func @transform_2(%arg0: i32, %arg1: i32, %arg2: i32, %arg3: memref<2x8xi32, #tpu.memory_space<smem>>, %arg4: memref<2x8xi32, #tpu.memory_space<smem>>) -> (i32, i32, i32) {
    %c0_i32 = arith.constant 0 : i32
    %c0_i32_0 = arith.constant 0 : i32
    %c0_i32_1 = arith.constant 0 : i32
    %c0_i32_2 = arith.constant 0 : i32
    return %c0_i32, %c0_i32_0, %c0_i32_1 : i32, i32, i32
  }
  func.func @transform_3(%arg0: i32, %arg1: i32, %arg2: i32, %arg3: memref<2x8xi32, #tpu.memory_space<smem>>, %arg4: memref<2x8xi32, #tpu.memory_space<smem>>) -> (i32, i32) {
    %c0_i32 = arith.constant 0 : i32
    %c0_i32_0 = arith.constant 0 : i32
    %c0_i32_1 = arith.constant 0 : i32
    return %c0_i32, %c0_i32_0 : i32, i32
  }
  func.func @transform_4(%arg0: i32, %arg1: i32, %arg2: i32, %arg3: memref<2x8xi32, #tpu.memory_space<smem>>, %arg4: memref<2x8xi32, #tpu.memory_space<smem>>) -> (i32, i32, i32) {
    %c0_i32 = arith.constant 0 : i32
    return %arg0, %arg1, %arg2 : i32, i32, i32
  }
}

</mosaic_0001>

<bundles_post_ra>
// kernel: tpu_custom_call.1
= control target key start
LH: loop header
LB: loop body
LE: loop exit
PB: predicated region body
PF: predicated region fallthrough
CT: control target
= control target key end

     0   :  { %s1195_s27 = smov [#allocation3]   ;;  %s1196_s28 = smov [#allocation4]   ;;  %s1689_s0 = inlined_call_operand.vmem [shape: s32[2,8], index: 0, kind: input, shape index: {}]   ;;  %s1690_s2 = inlined_call_operand.vmem [shape: s32[2,8,1], index: 2, kind: input, shape index: {}]   ;;  %s1691_s3 = inlined_call_operand.vmem [shape: s32[2,8,1], index: 3, kind: input, shape index: {}]   ;;  %s1692_s4 = inlined_call_operand.hbm [shape: f32[4,128,128], index: 4, kind: input, shape index: {}]   ;;  %s1693_s5 = inlined_call_operand.vmem [shape: f32[1,128], index: 5, kind: input, shape index: {}]   ;;  %s1694_s6 = inlined_call_operand.hbm [shape: f32[2,8,256], index: 6, kind: output, shape index: {}]   ;;  %s1695_s1 = inlined_call_operand.vmem [shape: s32[2,8], index: 1, kind: input, shape index: {}]  }
   0x1   :  { %1698 = sst [smem:[#allocation14_spill]] %s1692_s4  ;;  %s12_s23 = sshll.u32 %s1689_s0, 4  ;;  %s13_s23 = int_to_ptr.vmem [resolvable:$true] %s12_s23 }
   0x2   :  { %s17_s26 = sshll.u32 %s1695_s1, 4  ;;  %s18_s26 = int_to_ptr.vmem [resolvable:$true] %s17_s26 }
   0x3   :  { %15 = dma.vmem_to_smem %s13_s23, 32, %s1195_s27, [#allocation2] }
   0x4   :  { %20 = dma.vmem_to_smem %s18_s26, 32, %s1196_s28, [#allocation2] }
   0x5   :  { %1161 = dma.done.wait [#allocation2], 64 }
   0x6   :  { %1162 = vsyncadd [#allocation2], 4294967232 }
   0x7   :  { %23 = sfence }
   0x8   :  { %24 = vsyncpa [#allocation6], 0 }
   0x9   :  { %25 = vsyncpa [#allocation7], 0 }
   0xa   :  { %27 = vsyncpa [#allocation7 + $0x1], 0  ;;  %s1243_s29 = smov 0   ;;  %s1245_s30 = smov 0  }
   0xb   :  { %s1247_s0 = smov 0   ;;  %s1249_s7 = smov 0  }
   0xc   :  { %s1251_s1 = smov 0   ;;  %s1253_s8 = smov 0  }
   0xd LB: > { %1699 = sst [smem:[#allocation12_spill]] %s1189_s1  ;;  %s939_s9 = sadd.s32 4294967295, %s1193_s8   ;;  %s1193_s8 = sphi %s1253_s8, %s33_s8   ;;  %s1189_s1 = sphi %s1251_s1, %s1705_s1   ;;  %s1185_s7 = sphi %s1249_s7, %s1704_s7   ;;  %s1181_s0 = sphi %s1247_s0, %s1708_s0   ;;  %s1177_s30 = sphi %s1245_s30, %s1707_s30   ;;  %s1173_s29 = sphi %s1243_s29, %s1706_s29  }
   0xe   : > { %s940_s10 = sadd.s32 4294967294, %s1193_s8   ;;  %s52_s11 = sadd.s32 1, %s1189_s1 }
   0xf   : > { %s161_s12 = sadd.s32 1, %s1181_s0  ;;  %p54_p0 = scmp.ge.s32.totalorder %s52_s11, 2 }
  0x10   : > { %p171_p1 = scmp.ne.s32.totalorder %s1181_s0, %s1177_s30  ;;  %p172_p2 = scmp.eq.s32.totalorder %s939_s9, 1 }
  0x11   : > { %p177_p3 = scmp.ne.s32.totalorder %s1177_s30, %s1173_s29  ;;  %s1710_s11 = smov (%p54_p0, %s52_s11), 0 }
  0x12   : > { %1700 = sst [smem:[#allocation13_spill]] %s1710_s11  ;;  %p1283_p4 = por %p172_p2, %p171_p1 }
  0x13   : > { %p178_p5 = scmp.eq.s32.totalorder %s940_s10, 1  ;;  %s154_s14 = ssub.s32 %s1189_s1, %s1710_s11 }
  0x14   : > { %p941_p6 = scmp.ge.s32.totalorder %s1193_s8, 1  ;;  %p159_p7 = scmp.eq.s32.totalorder %s154_s14, 0 }
  0x15   : > { %p1290_p8 = por %p178_p5, %p177_p3  ;;  %p185_p9 = scmp.lt.s32.totalorder %s1193_s8, 3 }
  0x16   : > { %s1296_s16 = scalar_select %p159_p7, %s1181_s0, %s161_s12  }
  0x17   : > { %p186_p10 = pnand %p941_p6, %p185_p9  ;;  %p993_p11 = scmp.eq.s32.totalorder %s939_s9, 0 }
  0x18   : > { %s1703_s4 = sld [smem:[#allocation14_spill]]  ;;  %s1197_s20 = smov [#allocation5]  }
  0x19   : > { %p985_p12 = pneg %p186_p10  ;;  %s198_s21 = sshll.u32 %s1197_s20, 4  ;;  %s199_s21 = int_to_ptr.vmem [resolvable:$true] %s198_s21 }
  0x1a   : > { %s1198_s22 = smov 128   ;;  %s1199_s23 = smov 8  }
  0x1b   : > { %p986_p13 = pnand %p993_p11, %p985_p12  ;;  %237 = sbr.rel (%p186_p10) target bundleno = 344 (0x158), region = 36 }
  0x1e   : > { %s196_s19 = sshll.u32 %s1703_s4, 4  ;;  %s197_s19 = int_to_ptr.hbm [resolvable:$true] %s196_s19 }
  0x1f   : > { %988 = dma.hbm_to_vmem [thread:$0]  (!%p986_p13), %s197_s19, 8192, %s199_s21, [#allocation6], %s1198_s22, %s1198_s22, %s1199_s23  }
  0x20   : > { %1164 = dma.done.wait (%p993_p11), [#allocation6], 8192  }
  0x21   : > { %1166 = vsyncadd (%p993_p11), [#allocation6], 4294959104  ;;  %p273_p0 = scmp.lt.s32.totalorder %s1185_s7, 1  ;;  %s1303_s24 = sshll.u32 %s1185_s7, 7  ;;  %v1200_v0 = vmov 0   ;;  %v1339_v16 = vld [vmem:[#allocation5 + $0x178] sm:$0xff] }
  0x22   : > { %1053 = vset.pattern.permute.xlu1 %v1200_v0  ;;  %1052 = vset.pattern.permute.xlu0 %v1200_v0  ;;  %s492_s25 = sadd.s32 3, %s1303_s24  ;;  %s427_s28 = sadd.s32 2, %s1303_s24  ;;  %v1341_v17 = vld [vmem:[#allocation5 + $0x1f8] sm:$0xff]  ;;  %v1343_v18 = vld [vmem:[#allocation5 + $0x170] sm:$0xff]  ;;  %v1350_v22 = vld [vmem:[#allocation5 + $0x168] sm:$0xff] }
  0x23   : > { %1051 = vset.pattern.permute.xlu2 %v1200_v0  ;;  %s274_s26 = scalar_select %p273_p0, %s1185_s7, 1  ;;  %464 = vmatpush.msra.mxu2 %v1339_v16  ;;  %v1348_v21 = vld [vmem:[#allocation5 + $0x1f0] sm:$0xff]  ;;  %v1352_v23 = vld [vmem:[#allocation5 + $0x78] sm:$0xff]  ;;  %v1361_v25 = vld [vmem:[#allocation5 + $0x1e8] sm:$0xff] }
  0x24   : > { %s493_s27 = sld [smem:[#allocation3 + %s492_s25]]  ;;  %s343_s21 = sadd.s32 1, %s1303_s24  ;;  %529 = vmatpush.msra.mxu3 %v1341_v17  ;;  %v1363_v26 = vld [vmem:[#allocation5 + $0x70] sm:$0xff]  ;;  %v1366_v28 = vld [vmem:[#allocation5 + $0x160] sm:$0xff]  ;;  %400 = vmatpush.msra.mxu1 %v1352_v23  ;;  %v1380_v32 = vld [vmem:[#allocation5 + $0x158] sm:$0xff] }
  0x25   : > { %s947_s9 = sshll.u32 %s274_s26, 3  ;;  %s497_s10 = sld [smem:[#allocation4 + %s492_s25]]  ;;  %465 = vmatpush.msra.mxu2 %v1343_v18  ;;  %v1371_v29 = vld [vmem:[#allocation5 + $0x1e0] sm:$0xff]  ;;  %v1384_v33 = vld [vmem:[#allocation5 + $0x1d8] sm:$0xff]  ;;  %v1390_v34 = vld [vmem:[#allocation5 + $0x150] sm:$0xff] }
  0x26   : > { %s279_s17 = scalar_lea.vmem %s1690_s2, %s947_s9  ;;  %s428_s18 = sld [smem:[#allocation3 + %s427_s28]]  ;;  %530 = vmatpush.msra.mxu3 %v1348_v21  ;;  %401 = vmatpush.msra.mxu1 %v1363_v26  ;;  %v1394_v37 = vld [vmem:[#allocation5 + $0x1d0] sm:$0xff]  ;;  %v1409_v49 = vld [vmem:[#allocation5 + $0x68] sm:$0xff]  ;;  %v1417_v52 = vld [vmem:[#allocation5 + $0x60] sm:$0xff] }
  0x27   : > { %s432_s19 = sld [smem:[#allocation4 + %s427_s28]]  ;;  %v1311_v1 = vld [vmem:[%s279_s17] sm:$0xff]  ;;  %s286_s1 = scalar_lea.vmem %s1691_s3, %s947_s9  ;;  %466 = vmatpush.msra.mxu2 %v1350_v22  ;;  %v1411_v50 = vld [vmem:[#allocation5 + $0x148] sm:$0xff]  ;;  %v1424_v55 = vld [vmem:[#allocation5 + $0xf8] sm:$0xff] }
  0x28   : > { %s301_s20 = sld [smem:[#allocation3 + %s1303_s24]]  ;;  %s689_s14 = sadd.s32 6, %s1303_s24  ;;  %v1324_v6 = vld [vmem:[%s286_s1] sm:$0xff]  ;;  %531 = vmatpush.msra.mxu3 %v1361_v25  ;;  %v1413_v51 = vld [vmem:[#allocation5 + $0x1c8] sm:$0xff]  ;;  %402 = vmatpush.msra.mxu1 %v1409_v49  ;;  %v1426_v56 = vld [vmem:[#allocation5 + $0x58] sm:$0xff] }
  0x29   : > { %s305_s23 = sld [smem:[#allocation4 + %s1303_s24]]  ;;  %s753_s11 = sadd.s32 7, %s1303_s24  ;;  %467 = vmatpush.msra.mxu2 %v1366_v28  ;;  %v1419_v53 = vld [vmem:[#allocation5 + $0x140] sm:$0xff]  ;;  %v1428_v57 = vld [vmem:[#allocation5 + $0x138] sm:$0xff]  ;;  %v1434_v59 = vld [vmem:[#allocation5 + $0xf0] sm:$0xff]  ;;  %380 = vmatpush.msra.mxu0 %v1424_v55 }
  0x2a   : > { %s494_s22 = ssub.s32 16, %s493_s27  ;;  %s348_s26 = sld [smem:[#allocation4 + %s343_s21]]  ;;  %532 = vmatpush.msra.mxu3 %v1371_v29  ;;  %v1421_v54 = vld [vmem:[#allocation5 + $0x1c0] sm:$0xff]  ;;  %403 = vmatpush.msra.mxu1 %v1417_v52  ;;  %v1432_v58 = vld [vmem:[#allocation5 + $0x1b8] sm:$0xff]  ;;  %v1438_v60 = vld [vmem:[#allocation5 + $0x50] sm:$0xff] }
  0x2b   : > { %v495_v2 = vstv %s494_s22  ;;  %s498_s25 = ssub.s32 80, %s497_s10  ;;  %s1320_s28 = sld [smem:[#allocation3 + %s343_s21]]  ;;  %468 = vmatpush.msra.mxu2 %v1380_v32  ;;  %v1440_v61 = vld [vmem:[#allocation5 + $0x130] sm:$0xff]  ;;  %381 = vmatpush.msra.mxu0 %v1434_v59  ;;  %v1451_v63 = vld [vmem:[#allocation5 + $0xe8] sm:$0xff] }
  0x2c   : > { %v496_v3 = vadd.s32 %v495_v2, %v1311_v1  ;;  %s429_s12 = ssub.s32 16, %s428_s18  ;;  %v499_v7 = vstv %s498_s25  ;;  %s690_s10 = sld [smem:[#allocation3 + %s689_s14]]  ;;  %533 = vmatpush.msra.mxu3 %v1384_v33  ;;  %404 = vmatpush.msra.mxu1 %v1426_v56  ;;  %v1444_v62 = vld [vmem:[#allocation5 + $0x1b0] sm:$0xff]  ;;  %v1453_v0 = vld [vmem:[#allocation5 + $0x48] sm:$0xff] }
  0x2d   : > { %v430_v4 = vstv %s429_s12  ;;  %s433_s4 = ssub.s32 80, %s432_s19  ;;  %v500_v10 = vadd.s32 %v499_v7, %v1324_v6  ;;  %s1329_s18 = sld [smem:[#allocation3 + %s753_s11]]  ;;  %469 = vmatpush.msra.mxu2 %v1390_v34  ;;  %382 = vmatpush.msra.mxu0 %v1451_v63  ;;  %v1459_v2 = vld [vmem:[#allocation5 + $0x1a8] sm:$0xff]  ;;  %v1473_v7 = vld [vmem:[#allocation5 + $0xd8] sm:$0xff] }
  0x2e   : > { %502 = vperm.xlu1 %1053, %v496_v3   ;;  %v431_v5 = vadd.s32 %v430_v4, %v1311_v1  ;;  %s302_s27 = ssub.s32 16, %s301_s20  ;;  %v434_v11 = vstv %s433_s4  ;;  %s1334_s19 = sld [smem:[#allocation4 + %s689_s14]]  ;;  %534 = vmatpush.msra.mxu3 %v1394_v37  ;;  %v1463_v3 = vld [vmem:[#allocation5 + $0xe0] sm:$0xff] }
  0x2f   : > { %v303_v8 = vstv %s302_s27  ;;  %s306_s9 = ssub.s32 80, %s305_s23  ;;  %v435_v13 = vadd.s32 %v434_v11, %v1324_v6  ;;  %s563_s20 = sadd.s32 4, %s1303_s24  ;;  %470 = vmatpush.msra.mxu2 %v1411_v50  ;;  %405 = vmatpush.msra.mxu1 %v1438_v60  ;;  %v1465_v4 = vld [vmem:[#allocation5 + $0x40] sm:$0xff]  ;;  %v1483_v11 = vld [vmem:[#allocation5 + $0xd0] sm:$0xff] }
  0x30   : > { %437 = vperm.xlu0 %1052, %v431_v5   ;;  %v304_v9 = vadd.s32 %v303_v8, %v1311_v1  ;;  %v307_v12 = vstv %s306_s9  ;;  %s349_s17 = ssub.s32 80, %s348_s26  ;;  %s1337_s22 = sld [smem:[#allocation4 + %s753_s11]]  ;;  %535 = vmatpush.msra.mxu3 %v1413_v51  ;;  %v1467_v5 = vld [vmem:[#allocation5 + $0x120] sm:$0xff]  ;;  %v1475_v8 = vld [vmem:[#allocation5 + $0x38] sm:$0xff] }
  0x31   : > { %v308_v14 = vadd.s32 %v307_v12, %v1324_v6  ;;  %v350_v15 = vstv %s349_s17  ;;  %s345_s1 = ssub.s32 16, %s1320_s28  ;;  %s1357_s25 = sld [smem:[#allocation4 + %s563_s20]]  ;;  %471 = vmatpush.msra.mxu2 %v1419_v53  ;;  %406 = vmatpush.msra.mxu1 %v1453_v0  ;;  %v1487_v12 = vld [vmem:[#allocation5 + $0x30] sm:$0xff] }
  0x32   : > { %310 = vperm.xlu2 %1051, %v304_v9   ;;  %s691_s21 = ssub.s32 16, %s690_s10  ;;  %v351_v19 = vadd.s32 %v350_v15, %v1324_v6  ;;  %v346_v20 = vstv %s345_s1  ;;  %s606_s26 = sadd.s32 5, %s1303_s24  ;;  %536 = vmatpush.msra.mxu3 %v1421_v54  ;;  %v1479_v9 = vld [vmem:[#allocation5 + $0x118] sm:$0xff]  ;;  %v1499_v15 = vld [vmem:[#allocation5 + $0xc8] sm:$0xff] }
  0x33   : > { %v692_v24 = vstv %s691_s21  ;;  %s755_s23 = ssub.s32 16, %s1329_s18  ;;  %v347_v27 = vadd.s32 %v346_v20, %v1311_v1  ;;  %s1377_s28 = sld [smem:[#allocation3 + %s563_s20]]  ;;  %472 = vmatpush.msra.mxu2 %v1428_v57  ;;  %383 = vmatpush.msra.mxu0 %v1463_v3  ;;  %v1503_v20 = vld [vmem:[#allocation5 + $0x108] sm:$0xff] }
  0x34   : > { %v693_v30 = vadd.s32 %v692_v24, %v1311_v1  ;;  %v756_v31 = vstv %s755_s23  ;;  %s695_s12 = ssub.s32 80, %s1334_s19  ;;  %s607_s27 = sld [smem:[#allocation3 + %s606_s26]]  ;;  %537 = vmatpush.msra.mxu3 %v1432_v58  ;;  %407 = vmatpush.msra.mxu1 %v1465_v4  ;;  %v1507_v24 = vld [vmem:[#allocation5 + $0x188] sm:$0xff] }
  0x35   : > { %v757_v35 = vadd.s32 %v756_v31, %v1311_v1  ;;  %v696_v36 = vstv %s695_s12  ;;  %s611_s9 = sld [smem:[#allocation4 + %s606_s26]]  ;;  %473 = vmatpush.msra.mxu2 %v1440_v61  ;;  %384 = vmatpush.msra.mxu0 %v1473_v7  ;;  %v1515_v31 = vld [vmem:[#allocation5 + $0x100] sm:$0xff]  ;;  %s270_s24 = sand.u32 1, %s1177_s30  }
  0x36   : > { %506 = vperm.xlu1 %1053, %v500_v10   ;;  %s759_s14 = ssub.s32 80, %s1337_s22  ;;  %v697_v39 = vadd.s32 %v696_v36, %v1324_v6  ;;  %538 = vmatpush.msra.mxu3 %v1444_v62  ;;  %v1481_v10 = vld [vmem:[#allocation5 + $0x198] sm:$0xff]  ;;  %s946_s19 = sshll.u32 %s270_s24, 4 }
  0x37   : > { %v760_v38 = vstv %s759_s14  ;;  %s569_s4 = ssub.s32 80, %s1357_s25  ;;  %408 = vmatpush.msra.mxu1 %v1475_v8  ;;  %385 = vmatpush.msra.mxu0 %v1483_v11  ;;  %v1521_v36 = vld [vmem:[#allocation5 + $0xb8] sm:$0xff]  ;;  %s272_s20 = scalar_lea.vmem [#allocation8], %s946_s19 }
  0x38   : > { %441 = vperm.xlu0 %1052, %v435_v13   ;;  %v761_v40 = vadd.s32 %v760_v38, %v1324_v6  ;;  %v570_v41 = vstv %s569_s4  ;;  %539 = vmatpush.msra.mxu3 %v1459_v2  ;;  %v1489_v13 = vld [vmem:[#allocation5 + $0x110] sm:$0xff]  ;;  %v1523_v38 = vld [vmem:[#allocation5 + $0x18] sm:$0xff]  ;;  %s978_s21 = sshll.u32 %s1185_s7, 4  ;;  %s831_s26 = sshll.u32 %s272_s20, 4  ;;  %s832_s26 = int_to_ptr.vmem [resolvable:$true] %s831_s26 }
  0x39   : > { %s565_s11 = ssub.s32 16, %s1377_s28  ;;  %v571_v42 = vadd.s32 %v570_v41, %v1324_v6  ;;  %409 = vmatpush.msra.mxu1 %v1487_v12  ;;  %386 = vmatpush.msra.mxu0 %v1499_v15  ;;  %v1539_v41 = vld [vmem:[#allocation5 + $0xa8] sm:$0xff]  ;;  %s829_s25 = scalar_lea.hbm %s1694_s6, %s978_s21 }
  0x3a   : > { %314 = vperm.xlu2 %1051, %v308_v14   ;;  %s608_s10 = ssub.s32 16, %s607_s27  ;;  %v566_v43 = vstv %s565_s11  ;;  %v1491_v14 = vld [vmem:[#allocation5 + $0x190] sm:$0xff]  ;;  %s833_s12 = sshll.u32 %s829_s25, 4  ;;  %s834_s12 = int_to_ptr.hbm [resolvable:$true] %s833_s12 }
  0x3b   : > { %v609_v44 = vstv %s608_s10  ;;  %v567_v45 = vadd.s32 %v566_v43, %v1311_v1  ;;  %s612_s17 = ssub.s32 80, %s611_s9  ;;  %s814_s28 = scalar_lea.sflag [#allocation7], %s270_s24 }
  0x3c   : > { %v610_v46 = vadd.s32 %v609_v44, %v1311_v1  ;;  %v613_v47 = vstv %s612_s17  ;;  %v1455_v1 = vld [vmem:[#allocation5 + $0x128] sm:$0xff]  ;;  %s1123_s14 = sshra.s32 %s834_s12, 4  ;;  %s1129_s11 = scalar_lea.hbm %s1694_s6, 32  ;;  %s1124_s14 = int_to_ptr.hbm [resolvable:$true] %s1123_s14 }
  0x3d   : > { %v614_v48 = vadd.s32 %v613_v47, %v1324_v6  ;;  %474 = vmatpush.msra.mxu2 %v1455_v1  ;;  %v1471_v6 = vld [vmem:[#allocation5 + $0x1a0] sm:$0xff]  ;;  %s1125_s7 = scalar_lea.hbm %s1124_s14, 16  ;;  %p1130_p5 = scmp.lt.s32.totalorder %s1124_s14, %s1694_s6 }
  0x3e   : > { %357 = vperm.xlu1 %1053, %v351_v19   ;;  %540 = vmatpush.msra.mxu3 %v1471_v6  ;;  %v1501_v19 = vld [vmem:[#allocation5 + $0x28] sm:$0xff]  ;;  %p1126_p1 = scmp.ne.s32.totalorder %s1124_s14, %s1125_s7  ;;  %p1131_p6 = scmp.lt.s32.totalorder %s1129_s11, %s1125_s7 }
  0x3f   : > { %475 = vmatpush.msra.mxu2 %v1467_v5  ;;  %410 = vmatpush.msra.mxu1 %v1501_v19 }
  0x40   : > { %353 = vperm.xlu0 %1052, %v347_v27   ;;  %541 = vmatpush.msra.mxu3 %v1481_v10  ;;  %v1509_v27 = vld [vmem:[#allocation5 + $0xc0] sm:$0xff]  ;;  %p1127_p2 = pnand %p1126_p1, %p1283_p4  ;;  %p1132_p7 = por %p1131_p6, %p1130_p5 }
  0x41   : > { %476 = vmatpush.msra.mxu2 %v1479_v9  ;;  %387 = vmatpush.msra.mxu0 %v1509_v27 }
  0x42   : > { %699 = vperm.xlu2 %1051, %v693_v30   ;;  %542 = vmatpush.msra.mxu3 %v1491_v14  ;;  %v1511_v30 = vld [vmem:[#allocation5 + $0x20] sm:$0xff]  ;;  %p1128_p3 = pneg %p1127_p2 }
  0x43   : > { %477 = vmatpush.msra.mxu2 %v1489_v13  ;;  %411 = vmatpush.msra.mxu1 %v1511_v30 }
  0x44   : > { %543 = vmatpush.msra.mxu3 %v1507_v24  ;;  %388 = vmatpush.msra.mxu0 %v1521_v36  ;;  %p1133_p9 = pnand %p1132_p7, %p1128_p3 }
  0x45   : > { %478 = vmatpush.msra.mxu2 %v1503_v20  ;;  %412 = vmatpush.msra.mxu1 %v1523_v38 }
  0x46   : > { %763 = vperm.xlu1 %1053, %v757_v35   ;;  %v1517_v35 = vld [vmem:[#allocation5 + $0x180] sm:$0xff] }
  0x47   : > { %479 = vmatpush.msra.mxu2 %v1515_v31  ;;  %544 = vmatpush.msra.mxu3 %v1517_v35 }
  0x48   : > { %703 = vperm.xlu0 %1052, %v697_v39   ;;  %v1529_v39 = vld [vmem:[#allocation5 + $0xb0] sm:$0xff] }
  0x49   : > { %725 = vmatpush.msrb.mxu2 %v1339_v16  ;;  %789 = vmatpush.msrb.mxu3 %v1341_v17  ;;  %v1541_v16 = vld [vmem:[#allocation5 + $0x8] sm:$0xff]  ;;  %v1545_v17 = vld [vmem:[#allocation5 + $0xa0] sm:$0xff] }
  0x4a   : > { %767 = vperm.xlu2 %1051, %v761_v40   ;;  %v1531_v40 = vld [vmem:[#allocation5 + $0x10] sm:$0xff]  ;;  %389 = vmatpush.msra.mxu0 %v1529_v39 }
  0x4b   : > { %726 = vmatpush.msrb.mxu2 %v1343_v18  ;;  %790 = vmatpush.msrb.mxu3 %v1348_v21  ;;  %v1553_v18 = vld [vmem:[#allocation5 + $0x98] sm:$0xff]  ;;  %v1559_v21 = vld [vmem:[#allocation5 + $0x90] sm:$0xff] }
  0x4c   : > { %413 = vmatpush.msra.mxu1 %v1531_v40  ;;  %390 = vmatpush.msra.mxu0 %v1539_v41 }
  0x4d   : > { %727 = vmatpush.msrb.mxu2 %v1350_v22  ;;  %791 = vmatpush.msrb.mxu3 %v1361_v25  ;;  %v1567_v25 = vld [vmem:[#allocation5 + $0x88] sm:$0xff] }
  0x4e   : > { %577 = vperm.xlu1 %1053, %v571_v42   ;;  %v1547_v42 = vld [vmem:[#allocation5] sm:$0xff]  ;;  %414 = vmatpush.msra.mxu1 %v1541_v16 }
  0x4f   : > { %728 = vmatpush.msrb.mxu2 %v1366_v28  ;;  %792 = vmatpush.msrb.mxu3 %v1371_v29  ;;  %v1571_v28 = vld [vmem:[#allocation5 + $0x80] sm:$0xff] }
  0x50   : > { %573 = vperm.xlu0 %1052, %v567_v45   ;;  %391 = vmatpush.msra.mxu0 %v1545_v17 }
  0x51   : > { %415 = vmatpush.msra.mxu1 %v1547_v42  ;;  %729 = vmatpush.msrb.mxu2 %v1380_v32  ;;  %v1201_v32 = vmov 1.0  }
  0x52   : > { %616 = vperm.xlu2 %1051, %v610_v46   ;;  %793 = vmatpush.msrb.mxu3 %v1384_v33 }
  0x53   : > { %662 = vmatpush.msrb.mxu1 %v1352_v23  ;;  %392 = vmatpush.msra.mxu0 %v1553_v18  ;;  %v291_v23 = vlaneseq }
  0x54   : > { %730 = vmatpush.msrb.mxu2 %v1390_v34  ;;  %794 = vmatpush.msrb.mxu3 %v1394_v37 }
  0x55   : > { %663 = vmatpush.msrb.mxu1 %v1363_v26  ;;  %393 = vmatpush.msra.mxu0 %v1559_v21  ;;  %v1579_v26 = vand.u32 127, %v291_v23 }
  0x56   : > { %731 = vmatpush.msrb.mxu2 %v1411_v50  ;;  %795 = vmatpush.msrb.mxu3 %v1413_v51 }
  0x57   : > { %664 = vmatpush.msrb.mxu1 %v1409_v49  ;;  %394 = vmatpush.msra.mxu0 %v1567_v25 }
  0x58   : > { %620 = vperm.xlu0 %1052, %v614_v48   ;;  %732 = vmatpush.msrb.mxu2 %v1419_v53 }
  0x59   : > { %665 = vmatpush.msrb.mxu1 %v1417_v52  ;;  %796 = vmatpush.msrb.mxu3 %v1421_v54 }
  0x5a   : > { %395 = vmatpush.msra.mxu0 %v1571_v28  ;;  %733 = vmatpush.msrb.mxu2 %v1428_v57 }
  0x5b   : > { %666 = vmatpush.msrb.mxu1 %v1426_v56  ;;  %797 = vmatpush.msrb.mxu3 %v1432_v58 }
  0x5c   : > { %642 = vmatpush.msrb.mxu0 %v1424_v55  ;;  %734 = vmatpush.msrb.mxu2 %v1440_v61 }
  0x5d   : > { %667 = vmatpush.msrb.mxu1 %v1438_v60  ;;  %798 = vmatpush.msrb.mxu3 %v1444_v62 }
  0x5e   : > { %643 = vmatpush.msrb.mxu0 %v1434_v59  ;;  %735 = vmatpush.msrb.mxu2 %v1455_v1  ;;  %v1054_v59 = vld [vmem:[%s1693_s5] ss:$0 sm:$0xff] }
  0x5f   : > { %668 = vmatpush.msrb.mxu1 %v1453_v0  ;;  %799 = vmatpush.msrb.mxu3 %v1459_v2 }
  0x60   : > { %644 = vmatpush.msrb.mxu0 %v1451_v63  ;;  %736 = vmatpush.msrb.mxu2 %v1467_v5 }
  0x61   : > { %669 = vmatpush.msrb.mxu1 %v1465_v4  ;;  %800 = vmatpush.msrb.mxu3 %v1471_v6 }
  0x62   : > { %645 = vmatpush.msrb.mxu0 %v1463_v3  ;;  %737 = vmatpush.msrb.mxu2 %v1479_v9 }
  0x63   : > { %670 = vmatpush.msrb.mxu1 %v1475_v8  ;;  %801 = vmatpush.msrb.mxu3 %v1481_v10 }
  0x64   : > { %646 = vmatpush.msrb.mxu0 %v1473_v7  ;;  %738 = vmatpush.msrb.mxu2 %v1489_v13 }
  0x65   : > { %671 = vmatpush.msrb.mxu1 %v1487_v12  ;;  %802 = vmatpush.msrb.mxu3 %v1491_v14 }
  0x66   : > { %647 = vmatpush.msrb.mxu0 %v1483_v11  ;;  %739 = vmatpush.msrb.mxu2 %v1503_v20 }
  0x67   : > { %672 = vmatpush.msrb.mxu1 %v1501_v19  ;;  %803 = vmatpush.msrb.mxu3 %v1507_v24 }
  0x68   : > { %648 = vmatpush.msrb.mxu0 %v1499_v15  ;;  %740 = vmatpush.msrb.mxu2 %v1515_v31 }
  0x69   : > { %673 = vmatpush.msrb.mxu1 %v1511_v30  ;;  %804 = vmatpush.msrb.mxu3 %v1517_v35 }
  0x6a   : > { %649 = vmatpush.msrb.mxu0 %v1509_v27 }
  0x6b   : > { %674 = vmatpush.msrb.mxu1 %v1523_v38 }
  0x6c   : > { %650 = vmatpush.msrb.mxu0 %v1521_v36 }
  0x6d   : > { %675 = vmatpush.msrb.mxu1 %v1531_v40 }
  0x6e   : > { %651 = vmatpush.msrb.mxu0 %v1529_v39 }
  0x6f   : > { %676 = vmatpush.msrb.mxu1 %v1541_v16 }
  0x70   : > { %652 = vmatpush.msrb.mxu0 %v1539_v41 }
  0x71   : > { %677 = vmatpush.msrb.mxu1 %v1547_v42 }
  0x72   : > { %653 = vmatpush.msrb.mxu0 %v1545_v17 }
  0x74   : > { %654 = vmatpush.msrb.mxu0 %v1553_v18 }
  0x76   : > { %655 = vmatpush.msrb.mxu0 %v1559_v21 }
  0x78   : > { %656 = vmatpush.msrb.mxu0 %v1567_v25 }
  0x7a   : > { %657 = vmatpush.msrb.mxu0 %v1571_v28 }
  0x8c   : > { %v311_v22 = vpop.permute.xlu2 %310 }
  0x8d   : > { %vm312_vm0 = vcmp.eq.s32.totalorder %v1579_v26, %v311_v22 }
  0x94   : > { %v315_v29 = vpop.permute.xlu2 %314 }
  0x95   : > { %vm316_vm1 = vcmp.eq.s32.totalorder %v1579_v26, %v315_v29 }
  0x96   : > { %vm317_vm2 = vmor %vm312_vm0, %vm316_vm1 }
  0x97   : > { %954 = vmatmul.msk.f32.vlgmr.msra.gmra.mxu1 %vm317_vm2, %v1201_v32 }
  0x9c   : > { %v700_v44 = vpop.permute.xlu2 %699 }
  0x9d   : > { %vm701_vm15 = vcmp.eq.s32.totalorder %v1579_v26, %v700_v44 }
  0xa0   : > { %v503_v33 = vpop.permute.xlu1 %502 }
  0xa1   : > { %vm504_vm3 = vcmp.eq.s32.totalorder %v1579_v26, %v503_v33 }
  0xa2   : > { %v438_v34 = vpop.permute.xlu0 %437 }
  0xa3   : > { %vm439_vm6 = vcmp.eq.s32.totalorder %v1579_v26, %v438_v34 }
  0xa4   : > { %v768_v47 = vpop.permute.xlu2 %767 }
  0xa5   : > { %vm769_vm12 = vcmp.eq.s32.totalorder %v1579_v26, %v768_v47 }
  0xa8   : > { %v507_v37 = vpop.permute.xlu1 %506 }
  0xa9   : > { %vm508_vm4 = vcmp.eq.s32.totalorder %v1579_v26, %v507_v37 }
  0xaa   : > { %vm509_vm5 = vmor %vm504_vm3, %vm508_vm4  ;;  %v442_v43 = vpop.permute.xlu0 %441 }
  0xab   : > { %960 = vmatmul.msk.f32.vlgmr.msra.gmra.mxu3 %vm509_vm5, %v1201_v32  ;;  %vm443_vm7 = vcmp.eq.s32.totalorder %v1579_v26, %v442_v43 }
  0xac   : > { %vm444_vm8 = vmor %vm439_vm6, %vm443_vm7  ;;  %v617_v52 = vpop.permute.xlu2 %616 }
  0xad   : > { %957 = vmatmul.msk.f32.vlgmr.msra.gmra.mxu2 %vm444_vm8, %v1201_v32  ;;  %vm618_vm5 = vcmp.eq.s32.totalorder %v1579_v26, %v617_v52 }
  0xb0   : > { %v358_v45 = vpop.permute.xlu1 %357 }
  0xb1   : > { %vm359_vm9 = vcmp.eq.s32.totalorder %v1579_v26, %v358_v45 }
  0xb2   : > { %v354_v46 = vpop.permute.xlu0 %353 }
  0xb3   : > { %vm355_vm10 = vcmp.eq.s32.totalorder %v1579_v26, %v354_v46 }
  0xb4   : > { %vm360_vm11 = vmor %vm355_vm10, %vm359_vm9 }
  0xb5   : > { %953 = vmatmul.msk.f32.vlgmr.msra.gmra.mxu0 %vm360_vm11, %v1201_v32 }
  0xb8   : > { %v764_v48 = vpop.permute.xlu1 %763 }
  0xb9   : > { %vm765_vm13 = vcmp.eq.s32.totalorder %v1579_v26, %v764_v48 }
  0xba   : > { %vm770_vm14 = vmor %vm765_vm13, %vm769_vm12  ;;  %v704_v49 = vpop.permute.xlu0 %703 }
  0xbb   : > { %972 = vmatmul.msk.f32.vlgmr.msrb.gmra.mxu3 %vm770_vm14, %v1201_v32  ;;  %vm705_vm0 = vcmp.eq.s32.totalorder %v1579_v26, %v704_v49 }
  0xbc   : > { %vm706_vm1 = vmor %vm701_vm15, %vm705_vm0 }
  0xbd   : > { %969 = vmatmul.msk.f32.vlgmr.msrb.gmra.mxu2 %vm706_vm1, %v1201_v32 }
  0xc0   : > { %v578_v50 = vpop.permute.xlu1 %577 }
  0xc1   : > { %vm579_vm2 = vcmp.eq.s32.totalorder %v1579_v26, %v578_v50 }
  0xc2   : > { %v574_v51 = vpop.permute.xlu0 %573 }
  0xc3   : > { %vm575_vm3 = vcmp.eq.s32.totalorder %v1579_v26, %v574_v51 }
  0xc4   : > { %vm580_vm4 = vmor %vm575_vm3, %vm579_vm2 }
  0xc5   : > { %966 = vmatmul.msk.f32.vlgmr.msrb.gmra.mxu1 %vm580_vm4, %v1201_v32 }
  0xca   : > { %v621_v53 = vpop.permute.xlu0 %620 }
  0xcb   : > { %vm622_vm6 = vcmp.eq.s32.totalorder %v1579_v26, %v621_v53 }
  0xcc   : > { %vm623_vm7 = vmor %vm618_vm5, %vm622_vm6 }
  0xcd   : > { %965 = vmatmul.msk.f32.vlgmr.msrb.gmra.mxu0 %vm623_vm7, %v1201_v32 }
 0x114   : > { %v417_v54 = vpop.f32.mrf.mxu1 }
 0x12e   : > { %v546_v60 = vpop.f32.mrf.mxu3 }
 0x130   : > { %v481_v57 = vpop.f32.mrf.mxu2 }
 0x132   : > { %v397_v55 = vpop.f32.mrf.mxu0 }
 0x133   : > { %v418_v56 = vadd.f32 %v417_v54, %v397_v55 }
 0x135   : > { %v484_v58 = vadd.f32 %v481_v57, %v418_v56 }
 0x137   : > { %v549_v61 = vadd.f32 %v546_v60, %v484_v58 }
 0x139   : > { %v553_v62 = vadd.f32 %v1054_v59, %v549_v61 }
 0x13b   : > { %v554_v63 = vmax.f32 %v553_v62, 0.0 }
 0x13d   : > { %555 = vst [vmem:[%s272_s20] sm:$0xff] %v554_v63 }
 0x13e   : > { %v806_v5 = vpop.f32.mrf.mxu3 }
 0x140   : > { %v742_v3 = vpop.f32.mrf.mxu2 }
 0x142   : > { %v679_v0 = vpop.f32.mrf.mxu1 }
 0x14a   : > { %v659_v1 = vpop.f32.mrf.mxu0 }
 0x14b   : > { %v680_v2 = vadd.f32 %v679_v0, %v659_v1 }
 0x14d   : > { %v745_v4 = vadd.f32 %v742_v3, %v680_v2 }
 0x14f   : > { %v809_v6 = vadd.f32 %v806_v5, %v745_v4 }
 0x151   : > { %v810_v7 = vadd.f32 %v1054_v59, %v809_v6 }
 0x153   : > { %v811_v8 = vmax.f32 %v810_v7, 0.0 }
 0x155   : > { %812 = vst [vmem:[%s272_s20 + $0x8] sm:$0xff] %v811_v8 }
 0x156   : > { %1136 = shalt.err (!%p1133_p9)
}
 0x157   : > { %983 = dma.vmem_to_hbm [thread:$0]  (%p1283_p4), %s832_s26, 256, %s834_s12, %s814_s28  }
 0x158 PF: > { %p995_p10 = scmp.ge.s32.totalorder %s1193_s8, 2  ;;  %s845_s17 = sand.u32 1, %s1173_s29  }
 0x159   : > { %s846_s24 = scalar_lea.sflag [#allocation7], %s845_s17 }
 0x15a   : > { %p990_p11 = pnand %p995_p10, %p1290_p8 }
 0x15c   : > { %p991_p12 = pneg %p990_p11 }
 0x15e   : > { %1168 = dma.done.wait (%p991_p12), %s846_s24, 256  }
 0x15f   : > { %1170 = vsyncadd (%p991_p12), %s846_s24, 4294967040  ;;  %s33_s8 = sadd.s32 1, %s1193_s8   ;;  %s1704_s7 = sld [smem:[#allocation12_spill]] }
 0x160   : > { %p30_p13 = scmp.ge.s32.totalorder %s33_s8, 4   ;;  %s1705_s1 = sld [smem:[#allocation13_spill]] }
 0x161   : > { %s1706_s29 = smov %s1177_s30  ;;  %s1707_s30 = smov %s1181_s0 }
 0x162   : > { %s1708_s0 = smov %s1296_s16  ;;  %32 = sbr.rel (!%p30_p13) target bundleno = 13 (0xd), region = 82 }
 0x167   :  { %852 = vsyncpa [#allocation6], 1 }
 0x168   :  { %854 = vsyncpa [#allocation6 + $0x1], 1 }
 0x169   :  { %855 = vsyncpa [#allocation7], 1 }
 0x16a   :  { %857 = vsyncpa [#allocation7 + $0x1], 1 }

</bundles_post_ra>
